<compile_context>
chip_gen: v6e
topology: v6e:2x2x1
jax: 0.10.0
libtpu: 0.0.40
codegen_flags: <defaults>
</compile_context>

<pallas_src>
import functools
import math

import jax
import jax.numpy as jnp
from jax.experimental import pallas as pl
from jax.experimental.pallas import tpu as pltpu


_LANE = 128
_VMEM_BUDGET = 24 * 1024 * 1024     # target double-buffered working set
_VMEM_LIMIT = 32 * 1024 * 1024      # scoped VMEM limit (OK on v5e..v7x)


# ----------------------------------------------------------------------------
# Small helpers
# ----------------------------------------------------------------------------
def _round_up(x, m):
    return ((x + m - 1) // m) * m


def _largest_divisor_tile(dp, pref, align):
    """Largest t <= pref with t % align == 0 and dp % t == 0 (dp % align == 0)."""
    if dp <= pref:
        return dp
    t = (min(pref, dp) // align) * align
    while t > align:
        if dp % t == 0:
            return t
        t -= align
    return align


def _next_smaller_tile(dp, t, align):
    """Next smaller divisor-of-dp tile (multiple of align); returns t if none."""
    nt = t - align
    while nt >= align:
        if dp % nt == 0:
            return nt
        nt -= align
    return t


def _has_megacore():
    """True if the chip exposes >1 TensorCore that dimension_semantics can use."""
    try:
        kind = jax.devices()[0].device_kind.lower()
    except Exception:
        return False
    return any(v in kind for v in ("v3", "v4", "v7"))


def _apply_activation(h, activation):
    if activation is None:
        return h
    if callable(activation):
        return activation(h)
    if activation == "tanh":
        return jnp.tanh(h)
    if activation == "relu":
        return jnp.maximum(h, 0.0)
    if activation == "sigmoid":
        return jax.nn.sigmoid(h)
    raise ValueError(f"unsupported activation: {activation!r}")


# ----------------------------------------------------------------------------
# Kernels
# ----------------------------------------------------------------------------
def _matmul_tile(x_ref, w_ref, compute_dtype):
    a = x_ref[...]
    w = w_ref[...]
    if compute_dtype is not None:
        # In-kernel cast: operands hit the MXU at the low-precision rate while
        # the HBM streams stay in their original dtype (x) / persistent dtype (W).
        a = a.astype(compute_dtype)
        w = w.astype(compute_dtype)
    return jnp.dot(a, w, preferred_element_type=jnp.float32)


def _kernel_single_k(*refs, activation, has_bias, compute_dtype):
    # refs: x, w, [b], o   -- 2-D grid, one K step, no accumulator scratch.
    if has_bias:
        x_ref, w_ref, b_ref, o_ref = refs
    else:
        x_ref, w_ref, o_ref = refs
        b_ref = None
    h = _matmul_tile(x_ref, w_ref, compute_dtype)
    if has_bias:
        h = h + b_ref[...].astype(jnp.float32)
    o_ref[...] = _apply_activation(h, activation).astype(o_ref.dtype)


def _kernel_multi_k(*refs, activation, has_bias, compute_dtype):
    # refs: x, w, [b], o, acc -- 3-D grid, K last ("arbitrary"), f32 accumulator.
    if has_bias:
        x_ref, w_ref, b_ref, o_ref, acc_ref = refs
    else:
        x_ref, w_ref, o_ref, acc_ref = refs
        b_ref = None
    k = pl.program_id(2)

    @pl.when(k == 0)
    def _init():
        acc_ref[...] = jnp.zeros_like(acc_ref)

    acc_ref[...] += _matmul_tile(x_ref, w_ref, compute_dtype)

    @pl.when(k == pl.num_programs(2) - 1)
    def _finalize():
        h = acc_ref[...]
        if has_bias:
            h = h + b_ref[...].astype(jnp.float32)
        o_ref[...] = _apply_activation(h, activation).astype(o_ref.dtype)


# ----------------------------------------------------------------------------
# Module wrapper
# ----------------------------------------------------------------------------
def make_nonlinear(weight, bias=None, *, activation=None, compute_dtype=None,
                   block_b=None, block_n=None, block_k=None,
                   weight_layout="out_in"):
    """Build the forward fn for PyTorch's NonLinear (nn.Linear + activation).

    weight: (Out, In) like nn.Linear.weight ("out_in") or (In, Out) ("in_out").
    bias:   (Out,) or None (bias=False).
    activation: None | "tanh" | "relu" | "sigmoid" | callable on f32 arrays.
    compute_dtype: MXU operand dtype (e.g. jnp.bfloat16 on v6e/v7x). The weight
        is cast once here (persistent), x is cast inside the kernel, and the
        accumulation stays f32.

    The static weight/bias are padded & cast ONCE here (not per call); the
    returned function only pads x.
    """
    if weight_layout == "out_in":
        w_t = jnp.asarray(weight).T          # (In, Out)
    elif weight_layout == "in_out":
        w_t = jnp.asarray(weight)
    else:
        raise ValueError(f"bad weight_layout: {weight_layout!r}")
    In, Out = w_t.shape
    has_bias = bias is not None

    # Pad K/N once to lane multiples; tiles are later chosen as divisors of these.
    Kp = _round_up(In, _LANE)
    Np = _round_up(Out, _LANE)
    if (Kp, Np) != (In, Out):
        w_t = jnp.pad(w_t, ((0, Kp - In), (0, Np - Out)))
    if compute_dtype is not None:
        w_t = w_t.astype(compute_dtype)      # persistent low-precision weight
    b2d = None
    if has_bias:
        b2d = jnp.pad(jnp.asarray(bias, jnp.float32), (0, Np - Out)).reshape(1, Np)

    w_item = jnp.dtype(w_t.dtype).itemsize
    megacore = _has_megacore()
    pref_b = 256 if block_b is None else block_b
    pref_n = 1024 if block_n is None else block_n
    pref_k = 1024 if block_k is None else block_k

    def forward(x):
        x = jnp.asarray(x)
        assert x.shape[-1] == In, (x.shape, In)
        lead = x.shape[:-1]
        x2 = x.reshape(-1, In)
        B = x2.shape[0]
        out_dtype = x.dtype
        x_item = jnp.dtype(x.dtype).itemsize
        o_item = jnp.dtype(out_dtype).itemsize

        # Sublane alignment follows the packed MXU operand dtype.
        eff_item = jnp.dtype(compute_dtype).itemsize if compute_dtype is not None else x_item
        sub = 8 if eff_item >= 4 else (16 if eff_item == 2 else 32)

        Bp = _round_up(max(B, 1), sub)
        tb = _largest_divisor_tile(Bp, _round_up(pref_b, sub), sub)
        tn = _largest_divisor_tile(Np, pref_n, _LANE)
        tk = _largest_divisor_tile(Kp, pref_k, _LANE)

        # v7x-style megacore: make sure >=2 parallel grid tiles exist so the
        # second TensorCore is not idle. Prefer splitting N (re-streams only x).
        if megacore and (Bp // tb) * (Np // tn) < 2:
            tn_s = _next_smaller_tile(Np, tn, _LANE)
            if tn_s < tn:
                tn = tn_s
            else:
                tb_s = _next_smaller_tile(Bp, tb, sub)
                if tb_s < tb:
                    tb = tb_s

        # Keep the double-buffered working set inside the VMEM budget.
        def footprint(tb_, tn_, tk_):
            byt = 2 * (tb_ * tk_ * x_item + tk_ * tn_ * w_item + tb_ * tn_ * o_item)
            if has_bias:
                byt += 2 * tn_ * 4
            if (Kp // tk_) > 1:
                byt += tb_ * tn_ * 4          # f32 accumulator scratch
            return byt

        for _ in range(64):
            if footprint(tb, tn, tk) <= _VMEM_BUDGET:
                break
            nt = _next_smaller_tile(Kp, tk, _LANE)
            if nt < tk:
                tk = nt
                continue
            nt = _next_smaller_tile(Np, tn, _LANE)
            if nt < tn:
                tn = nt
                continue
            nt = _next_smaller_tile(Bp, tb, sub)
            if nt < tb:
                tb = nt
                continue
            break

        if (Bp, Kp) != (B, In):
            x2 = jnp.pad(x2, ((0, Bp - B), (0, Kp - In)))

        grid_m, grid_n, nk = Bp // tb, Np // tn, Kp // tk

        cost = pl.CostEstimate(
            flops=2 * B * In * Out,
            transcendentals=(B * Out) if activation in ("tanh", "sigmoid") else 0,
            bytes_accessed=(x_item * B * In + w_item * In * Out
                            + o_item * B * Out + (4 * Out if has_bias else 0)),
        )

        if nk == 1:
            kernel = functools.partial(
                _kernel_single_k, activation=activation,
                has_bias=has_bias, compute_dtype=compute_dtype)
            in_specs = [pl.BlockSpec((tb, tk), lambda i, j: (i, 0)),
                        pl.BlockSpec((tk, tn), lambda i, j: (0, j))]
            if has_bias:
                in_specs.append(pl.BlockSpec((1, tn), lambda i, j: (0, j)))
            grid_spec = pltpu.PrefetchScalarGridSpec(
                num_scalar_prefetch=0,
                grid=(grid_m, grid_n),
                in_specs=in_specs,
                out_specs=pl.BlockSpec((tb, tn), lambda i, j: (i, j)),
                scratch_shapes=[],
            )
            dims = ("parallel", "parallel")
        else:
            kernel = functools.partial(
                _kernel_multi_k, activation=activation,
                has_bias=has_bias, compute_dtype=compute_dtype)
            in_specs = [pl.BlockSpec((tb, tk), lambda i, j, k: (i, k)),
                        pl.BlockSpec((tk, tn), lambda i, j, k: (k, j))]
            if has_bias:
                in_specs.append(pl.BlockSpec((1, tn), lambda i, j, k: (0, j)))
            grid_spec = pltpu.PrefetchScalarGridSpec(
                num_scalar_prefetch=0,
                grid=(grid_m, grid_n, nk),
                in_specs=in_specs,
                out_specs=pl.BlockSpec((tb, tn), lambda i, j, k: (i, j)),
                scratch_shapes=[pltpu.VMEM((tb, tn), jnp.float32)],
            )
            dims = ("parallel", "parallel", "arbitrary")

        args = (x2, w_t, b2d) if has_bias else (x2, w_t)
        y = pl.pallas_call(
            kernel,
            out_shape=jax.ShapeDtypeStruct((Bp, Np), out_dtype),
            grid_spec=grid_spec,
            compiler_params=pltpu.CompilerParams(
                dimension_semantics=dims,
                vmem_limit_bytes=_VMEM_LIMIT,
            ),
            cost_estimate=cost,
        )(*args)

        return y[:B, :Out].reshape(*lead, Out)

    return jax.jit(forward)


def nonlinear(x, weight, bias=None, *, activation=None, compute_dtype=None,
              weight_layout="out_in", **kwargs):
    """One-shot convenience wrapper (prefer make_nonlinear for repeated calls)."""
    fwd = make_nonlinear(weight, bias, activation=activation,
                         compute_dtype=compute_dtype,
                         weight_layout=weight_layout, **kwargs)
    return fwd(x)


# ----------------------------------------------------------------------------
# Self-test
# ----------------------------------------------------------------------------
if __name__ == "__main__":
    key = jax.random.PRNGKey(0)
    k1, k2, k3, k4, k5, k6, k7, k8 = jax.random.split(key, 8)

    # --- Case 1: tiny shape, tanh, bias (single-K fast path) ---------------
    batch, in1, out1 = 8, 32, 64
    bound = 1.0 / math.sqrt(in1)
    w1 = jax.random.uniform(k1, (out1, in1), jnp.float32, -bound, bound)  # (out,in)
    b1 = jax.random.uniform(k2, (out1,), jnp.float32, -bound, bound)
    x1 = jax.random.normal(k3, (batch, in1), jnp.float32)

    fwd1 = make_nonlinear(w1, b1, activation="tanh")
    y1 = jax.block_until_ready(fwd1(x1))
    y1_ref = jnp.tanh(jnp.dot(x1, w1.T, precision=jax.lax.Precision.HIGHEST) + b1)
    assert y1.shape == (batch, out1)
    assert jnp.allclose(y1, y1_ref, atol=2e-5, rtol=1e-5), "mismatch (case 1)"

    # --- Case 2: ragged shape, relu, bias, forced multi-K accumulation -----
    batch2, in2, out2 = 200, 384, 640    # Out=640 -> tn=640 (no pad to 1024)
    bound2 = 1.0 / math.sqrt(in2)
    w2 = jax.random.uniform(k4, (out2, in2), jnp.float32, -bound2, bound2)
    b2 = jax.random.uniform(k5, (out2,), jnp.float32, -bound2, bound2)
    x2 = jax.random.normal(k6, (batch2, in2), jnp.float32)

    fwd2 = make_nonlinear(w2, b2, activation="relu", block_k=128)  # nk=3 path
    y2 = jax.block_until_ready(fwd2(x2))
    y2_ref = jnp.maximum(
        jnp.dot(x2, w2.T, precision=jax.lax.Precision.HIGHEST) + b2, 0.0)
    assert y2.shape == (batch2, out2)
    assert jnp.allclose(y2, y2_ref, atol=1e-4, rtol=1e-4), "mismatch (case 2)"

    # --- Case 3: bias=False, no activation, bf16 MXU compute ---------------
    batch3, in3, out3 = 64, 256, 384
    bound3 = 1.0 / math.sqrt(in3)
    w3 = jax.random.uniform(k7, (out3, in3), jnp.float32, -bound3, bound3)
    x3 = jax.random.normal(k8, (batch3, in3), jnp.float32)

    fwd3 = make_nonlinear(w3, None, activation=None, compute_dtype=jnp.bfloat16)
    y3 = jax.block_until_ready(fwd3(x3))
    y3_ref = jnp.dot(x3.astype(jnp.bfloat16), w3.T.astype(jnp.bfloat16),
                     preferred_element_type=jnp.float32)
    assert y3.shape == (batch3, out3)
    assert jnp.allclose(y3, y3_ref, atol=5e-3, rtol=5e-3), "mismatch (case 3)"

    print("KERNEL_OK")
</pallas_src>

<mosaic_0001>
module attributes {stable_mosaic.version = 11 : i64} {
  func.func @_kernel_single_k(%arg0: i32, %arg1: i32, %arg2: memref<8x128xf32, #tpu.memory_space<vmem>>, %arg3: memref<128x128xf32, #tpu.memory_space<vmem>>, %arg4: memref<1x128xf32, #tpu.memory_space<vmem>>, %arg5: memref<8x128xf32, #tpu.memory_space<vmem>>) attributes {dimension_semantics = [#tpu.dimension_semantics<parallel>, #tpu.dimension_semantics<parallel>], iteration_bounds = array<i64: 1, 1>, scalar_prefetch = 0 : i64, scratch_operands = 0 : i64, tpu.core_type = #tpu.core_type<tc>, window_params = [{transform_indices = @transform_0, window_bounds = array<i64: 8, 128>}, {transform_indices = @transform_1, window_bounds = array<i64: 128, 128>}, {transform_indices = @transform_2, window_bounds = array<i64: 1, 128>}, {transform_indices = @transform_3, window_bounds = array<i64: 8, 128>}]} {
    %c0 = arith.constant 0 : index
    %c0_0 = arith.constant 0 : index
    %0 = vector.load %arg2[%c0, %c0_0] : memref<8x128xf32, #tpu.memory_space<vmem>>, vector<8x128xf32>
    %c0_1 = arith.constant 0 : index
    %c0_2 = arith.constant 0 : index
    %1 = vector.load %arg3[%c0_1, %c0_2] : memref<128x128xf32, #tpu.memory_space<vmem>>, vector<128x128xf32>
    %cst = arith.constant dense<0.000000e+00> : vector<8x128xf32>
    %2 = tpu.matmul %0, %1, %cst {dimension_numbers = #tpu.dot_dimension_numbers<[1], [0], [0], [1], [0, 0, 1, 1], [], []>} : vector<8x128xf32>, vector<128x128xf32>, vector<8x128xf32> -> vector<8x128xf32>
    %c0_3 = arith.constant 0 : index
    %c0_4 = arith.constant 0 : index
    %3 = vector.load %arg4[%c0_3, %c0_4] : memref<1x128xf32, #tpu.memory_space<vmem>>, vector<1x128xf32>
    %4 = vector.broadcast %3 : vector<1x128xf32> to vector<8x128xf32>
    %5 = arith.addf %2, %4 : vector<8x128xf32>
    %6 = math.tanh %5 : vector<8x128xf32>
    %c0_5 = arith.constant 0 : index
    %c0_6 = arith.constant 0 : index
    %7 = vector.load %arg5[%c0_5, %c0_6] : memref<8x128xf32, #tpu.memory_space<vmem>>, vector<8x128xf32>
    tpu.vector_store %arg5[%c0_5, %c0_6], %6 {strides = array<i32>} : memref<8x128xf32, #tpu.memory_space<vmem>>, vector<8x128xf32>,
    return
  }
  func.func @transform_0(%arg0: i32, %arg1: i32) -> (i32, i32) {
    %c0_i32 = arith.constant 0 : i32
    %c0_i32_0 = arith.constant 0 : i32
    return %arg0, %c0_i32 : i32, i32
  }
  func.func @transform_1(%arg0: i32, %arg1: i32) -> (i32, i32) {
    %c0_i32 = arith.constant 0 : i32
    %c0_i32_0 = arith.constant 0 : i32
    return %c0_i32, %arg1 : i32, i32
  }
  func.func @transform_2(%arg0: i32, %arg1: i32) -> (i32, i32) {
    %c0_i32 = arith.constant 0 : i32
    %c0_i32_0 = arith.constant 0 : i32
    return %c0_i32, %arg1 : i32, i32
  }
  func.func @transform_3(%arg0: i32, %arg1: i32) -> (i32, i32) {
    %c0_i32 = arith.constant 0 : i32
    return %arg0, %arg1 : i32, i32
  }
}

</mosaic_0001>

<bundles_post_ra>
// kernel: forward.1
= control target key start
LH: loop header
LB: loop body
LE: loop exit
PB: predicated region body
PF: predicated region fallthrough
CT: control target
= control target key end

     0   :  { %8 = vsyncpa [#allocation3], 0  ;;  %s283_s0 = inlined_call_operand.vmem [shape: f32[8,128], index: 0, kind: input, shape index: {}]   ;;  %s284_s1 = inlined_call_operand.hbm [shape: f32[128,128], index: 1, kind: input, shape index: {}]   ;;  %s285_s2 = inlined_call_operand.vmem [shape: f32[1,128], index: 2, kind: input, shape index: {}]   ;;  %s286_s3 = inlined_call_operand.hbm [shape: f32[8,128], index: 3, kind: output, shape index: {}]  }
   0x1   :  { %9 = vsyncpa [#allocation4], 0  ;;  %s245_s12 = smov [#allocation2]  }
   0x2   :  { %s17_s13 = sshll.u32 %s245_s12, 4  ;;  %s18_s13 = int_to_ptr.vmem [resolvable:$true] %s17_s13 }
   0x3   :  { %s209_s14 = scalar_lea.vmem %s18_s13, 2048  ;;  %p214_p1 = scmp.lt.s32.totalorder %s18_s13, %s18_s13 }
   0x4   :  { %p210_p0 = scmp.ne.s32.totalorder %s18_s13, %s209_s14  ;;  %p215_p2 = scmp.lt.s32.totalorder %s209_s14, %s209_s14 }
   0x6   :  { %p216_p3 = por %p215_p2, %p214_p1 }
   0x8   :  { %p217_p4 = pnand %p216_p3, %p210_p0 }
   0xa   :  { %220 = shalt.err (!%p217_p4)
}
   0xb   :  { %s246_s15 = smov 128   ;;  %s247_s16 = smov 8  }
   0xc   :  { %23 = dma.hbm_to_vmem [thread:$0]  %s284_s1, 2048, %s18_s13, [#allocation3], %s246_s15, %s246_s15, %s247_s16  }
   0xd   :  { %241 = dma.done.wait [#allocation3], 2048  }
   0xe   :  { %242 = vsyncadd [#allocation3], 4294965248  ;;  %v248_v0 = vmov 0.0   ;;  %vm249_vm0 = vmmov 0   ;;  %v45_v1 = vld [vmem:[#allocation2 + $0x78] sm:$0xff]  ;;  %v44_v2 = vld [vmem:[#allocation2 + $0x70] sm:$0xff] }
   0xf   :  { %158 = vmatprep.subr.mxu0 %v248_v0  ;;  %190 = vmatprep.mubr.msk.f32.mxu0 %vm249_vm0, %v248_v0  ;;  %v43_v3 = vld [vmem:[#allocation2 + $0x68] sm:$0xff]  ;;  %v42_v4 = vld [vmem:[#allocation2 + $0x60] sm:$0xff]  ;;  %v41_v5 = vld [vmem:[#allocation2 + $0x58] sm:$0xff]  ;;  %s250_s22 = smov [#allocation5]  }
  0x10   :  { %159 = vmatpush3.msra.mxu0 %v45_v1  ;;  %v40_v6 = vld [vmem:[#allocation2 + $0x50] sm:$0xff]  ;;  %v39_v7 = vld [vmem:[#allocation2 + $0x48] sm:$0xff]  ;;  %v38_v8 = vld [vmem:[#allocation2 + $0x40] sm:$0xff]  ;;  %s131_s23 = sshll.u32 %s250_s22, 4  ;;  %s132_s23 = int_to_ptr.vmem [resolvable:$true] %s131_s23 }
  0x11   :  { %160 = vmatprep.subr.mxu0 %v248_v0  ;;  %v37_v9 = vld [vmem:[#allocation2 + $0x38] sm:$0xff]  ;;  %v36_v10 = vld [vmem:[#allocation2 + $0x30] sm:$0xff]  ;;  %v35_v11 = vld [vmem:[#allocation2 + $0x28] sm:$0xff]  ;;  %s221_s24 = scalar_lea.vmem %s132_s23, 128  ;;  %p226_p6 = scmp.lt.s32.totalorder %s132_s23, %s132_s23 }
  0x12   :  { %161 = vmatpush3.msra.mxu0 %v44_v2  ;;  %v34_v12 = vld [vmem:[#allocation2 + $0x20] sm:$0xff]  ;;  %v33_v13 = vld [vmem:[#allocation2 + $0x18] sm:$0xff]  ;;  %v32_v14 = vld [vmem:[#allocation2 + $0x10] sm:$0xff]  ;;  %p222_p5 = scmp.ne.s32.totalorder %s132_s23, %s221_s24  ;;  %p227_p7 = scmp.lt.s32.totalorder %s221_s24, %s221_s24 }
  0x13   :  { %162 = vmatprep.subr.mxu0 %v248_v0  ;;  %v31_v15 = vld [vmem:[#allocation2 + $0x8] sm:$0xff]  ;;  %v30_v16 = vld [vmem:[#allocation2] sm:$0xff] }
  0x14   :  { %163 = vmatpush3.msra.mxu0 %v43_v3  ;;  %v29_v17 = vld [vmem:[%s283_s0] sm:$0xff]  ;;  %p228_p8 = por %p227_p7, %p226_p6 }
  0x15   :  { %164 = vmatprep.subr.mxu0 %v248_v0  ;;  %v140_v18 = vld [vmem:[%s285_s2] ss:$0 sm:$0xff] }
  0x16   :  { %165 = vmatpush3.msra.mxu0 %v42_v4  ;;  %p229_p9 = pnand %p228_p8, %p222_p5 }
  0x17   :  { %166 = vmatprep.subr.mxu0 %v248_v0 }
  0x18   :  { %167 = vmatpush3.msra.mxu0 %v41_v5 }
  0x19   :  { %168 = vmatprep.subr.mxu0 %v248_v0 }
  0x1a   :  { %169 = vmatpush3.msra.mxu0 %v40_v6 }
  0x1b   :  { %170 = vmatprep.subr.mxu0 %v248_v0 }
  0x1c   :  { %171 = vmatpush3.msra.mxu0 %v39_v7 }
  0x1d   :  { %172 = vmatprep.subr.mxu0 %v248_v0 }
  0x1e   :  { %173 = vmatpush3.msra.mxu0 %v38_v8 }
  0x1f   :  { %174 = vmatprep.subr.mxu0 %v248_v0 }
  0x20   :  { %175 = vmatpush3.msra.mxu0 %v37_v9 }
  0x21   :  { %176 = vmatprep.subr.mxu0 %v248_v0 }
  0x22   :  { %177 = vmatpush3.msra.mxu0 %v36_v10 }
  0x23   :  { %178 = vmatprep.subr.mxu0 %v248_v0 }
  0x24   :  { %179 = vmatpush3.msra.mxu0 %v35_v11 }
  0x25   :  { %180 = vmatprep.subr.mxu0 %v248_v0 }
  0x26   :  { %181 = vmatpush3.msra.mxu0 %v34_v12 }
  0x27   :  { %182 = vmatprep.subr.mxu0 %v248_v0 }
  0x28   :  { %183 = vmatpush3.msra.mxu0 %v33_v13 }
  0x29   :  { %184 = vmatprep.subr.mxu0 %v248_v0 }
  0x2a   :  { %185 = vmatpush3.msra.mxu0 %v32_v14 }
  0x2b   :  { %186 = vmatprep.subr.mxu0 %v248_v0 }
  0x2c   :  { %187 = vmatpush3.msra.mxu0 %v31_v15 }
  0x2d   :  { %188 = vmatprep.subr.mxu0 %v248_v0 }
  0x2e   :  { %189 = vmatpush3.msra.mxu0 %v30_v16 }
  0x2f   :  { %191 = vmatmul.mubr.f32.vlgmr.msra.gmra.mxu0 %v29_v17 }
  0xef   :  { %v119_v19 = vpop.f32.mrf.mxu0 }
  0xf0   :  { %v120_v20 = vadd.f32 %v140_v18, %v119_v19 }
  0xf1   :  { %v192_v21 = vpop.f32.mrf.mxu0 }
  0xf2   :  { %199 = vtanh.f32 %v120_v20 }
  0xff   :  { %v200_v22 = vpop.eup %199 }
 0x100   :  { %124 = vst [vmem:[#allocation5] sm:$0xff] %v200_v22 }
 0x101   :  { %232 = shalt.err (!%p229_p9)
}
 0x102   :  { %134 = dma.vmem_to_hbm [thread:$0]  %s132_s23, 128, %s286_s3, [#allocation4]  }
 0x103   :  { %243 = dma.done.wait [#allocation4], 128  }
 0x104   :  { %244 = vsyncadd [#allocation4], 4294967168 }
 0x105   :  { %138 = vsyncpa [#allocation3], 1 }
 0x106   :  { %139 = vsyncpa [#allocation4], 1 }

</bundles_post_ra>
